<compile_context>
chip_gen: v5e
topology: v5e:2x2
jax: 0.10.0
libtpu: 0.0.40
codegen_flags: <defaults>
</compile_context>

<pallas_src>
import numpy as np

import jax
import jax.numpy as jnp
from jax import lax
from jax.experimental import pallas as pl
from jax.experimental.pallas import tpu as pltpu


# ----------------------------- fused Pallas kernel ---------------------------

def _fused_cnn_kernel(x_ref, w1_ref, b1_ref, w2_ref, b2_ref,
                      w3_ref, b3_ref, w4_ref, b4_ref, o_ref):
    # conv1 (folded into a banded matmul) + bias + ReLU        -> (tb, 16*HW)
    h1 = jnp.dot(x_ref[...], w1_ref[...], preferred_element_type=jnp.float32)
    h1 = jnp.maximum(h1 + b1_ref[...], 0.0)

    # conv2 (folded into a banded matmul) + bias + ReLU        -> (tb, 32*HW)
    h2 = jnp.dot(h1, w2_ref[...], preferred_element_type=jnp.float32)
    h2 = jnp.maximum(h2 + b2_ref[...], 0.0)

    # fc1 + ReLU  (h2 lanes are already in PyTorch NCHW-flatten order)
    h3 = jnp.dot(h2, w3_ref[...], preferred_element_type=jnp.float32)
    h3 = jnp.maximum(h3 + b3_ref[...], 0.0)                    # (tb, 64)

    # fc2 (out features = 1): VPU multiply + lane reduction, keep MXU free
    o_ref[...] = (jnp.sum(h3 * w4_ref[...], axis=-1, keepdims=True)
                  + b4_ref[...])                               # (tb, 1)


# ----------------------------- one-time param prep ---------------------------

def _conv3x3_same_as_matrix(w_oihw, H, W):
    """Fold a 3x3 stride-1 'same' conv (OIHW weights) into a dense matrix
    of shape (Ci*H*W, Co*H*W) acting on NCHW-flattened activations
    (index = c*H*W + h*W + w).  Out-of-image taps (e.g. kh=0/2 when H==1)
    simply never appear."""
    w = np.asarray(w_oihw, dtype=np.float32)
    Co, Ci, KH, KW = w.shape
    M = np.zeros((Ci * H * W, Co * H * W), dtype=np.float32)
    ci_base = np.arange(Ci) * (H * W)
    co_base = np.arange(Co) * (H * W)
    for ho in range(H):
        for wo in range(W):
            for kh in range(KH):
                for kw in range(KW):
                    hi = ho + kh - 1
                    wi = wo + kw - 1
                    if 0 <= hi < H and 0 <= wi < W:
                        rows = ci_base + hi * W + wi
                        cols = co_base + ho * W + wo
                        M[np.ix_(rows, cols)] = w[:, :, kh, kw].T
    return M


def prepare_params(params, H, W):
    """Host-side, one-time: fold im2col / flatten order / transposes into the
    weights so the forward pass is pure matmuls inside one kernel."""
    HW = H * W
    assert params["fc1_w"].shape[1] == 32 * HW, "fc1 expects 32*H*W features"
    rep = lambda b: np.repeat(np.asarray(b, np.float32), HW)[None, :]
    return {
        "w1": jnp.asarray(_conv3x3_same_as_matrix(params["conv1_w"], H, W)),  # (HW, 16*HW)
        "b1": jnp.asarray(rep(params["conv1_b"])),                            # (1, 16*HW)
        "w2": jnp.asarray(_conv3x3_same_as_matrix(params["conv2_w"], H, W)),  # (16*HW, 32*HW)
        "b2": jnp.asarray(rep(params["conv2_b"])),                            # (1, 32*HW)
        "w3": jnp.asarray(params["fc1_w"]).T,                                 # (32*HW, 64)
        "b3": jnp.asarray(params["fc1_b"])[None, :],                          # (1, 64)
        "w4": jnp.asarray(params["fc2_w"]),                                   # (1, 64)
        "b4": jnp.asarray(params["fc2_b"])[None, :],                          # (1, 1)
    }


# ----------------------------- forward (single pallas_call) ------------------

def cnn_forward(x, prep, *, block_b=1024):
    """x: (B, H, W) float32 with H*W == 8.  Returns (B, 1) float32."""
    B, H, W = x.shape
    HW = H * W
    x2 = x.reshape(B, HW)                     # NCHW flatten of the C=1 input

    # Batch tiling: one block at small B; 1024-row parallel tiles at large B
    # (1024 rows of all activations ~ 1.8 MiB f32 -> well inside 32 MiB
    #  scoped VMEM on v5e/v6e/v7x; weights stay resident via constant maps).
    tb = B if B <= block_b else block_b
    grid = (pl.cdiv(B, tb),)

    const = lambda shape: pl.BlockSpec(shape, lambda i: (0, 0))
    return pl.pallas_call(
        _fused_cnn_kernel,
        out_shape=jax.ShapeDtypeStruct((B, 1), jnp.float32),
        grid=grid,
        in_specs=[
            pl.BlockSpec((tb, HW), lambda i: (i, 0)),   # x tile
            const(prep["w1"].shape), const(prep["b1"].shape),
            const(prep["w2"].shape), const(prep["b2"].shape),
            const(prep["w3"].shape), const(prep["b3"].shape),
            const(prep["w4"].shape), const(prep["b4"].shape),
        ],
        out_specs=pl.BlockSpec((tb, 1), lambda i: (i, 0)),
        compiler_params=pltpu.CompilerParams(
            dimension_semantics=("parallel",)),
    )(x2, prep["w1"], prep["b1"], prep["w2"], prep["b2"],
      prep["w3"], prep["b3"], prep["w4"], prep["b4"])


# ----------------------------- reference (pure JAX) ---------------------------

def cnn_reference(x, params):
    x4 = x[:, None, :, :]
    dn = ("NCHW", "OIHW", "NCHW")
    y = lax.conv_general_dilated(x4, params["conv1_w"], (1, 1), "SAME",
                                 dimension_numbers=dn,
                                 precision=lax.Precision.HIGHEST)
    y = jax.nn.relu(y + params["conv1_b"][None, :, None, None])
    y = lax.conv_general_dilated(y, params["conv2_w"], (1, 1), "SAME",
                                 dimension_numbers=dn,
                                 precision=lax.Precision.HIGHEST)
    y = jax.nn.relu(y + params["conv2_b"][None, :, None, None])
    f = y.reshape(y.shape[0], -1)
    h = jax.nn.relu(
        jnp.dot(f, params["fc1_w"].T, precision=lax.Precision.HIGHEST)
        + params["fc1_b"])
    return (jnp.dot(h, params["fc2_w"].T, precision=lax.Precision.HIGHEST)
            + params["fc2_b"])


# ----------------------------- params -----------------------------------------

def init_params(key):
    def uniform(k, shape, fan_in):
        bound = 1.0 / jnp.sqrt(float(fan_in))
        return jax.random.uniform(k, shape, jnp.float32, -bound, bound)

    ks = jax.random.split(key, 8)
    return {
        "conv1_w": uniform(ks[0], (16, 1, 3, 3), 1 * 9),
        "conv1_b": uniform(ks[1], (16,), 1 * 9),
        "conv2_w": uniform(ks[2], (32, 16, 3, 3), 16 * 9),
        "conv2_b": uniform(ks[3], (32,), 16 * 9),
        "fc1_w":   uniform(ks[4], (64, 32 * 8), 32 * 8),
        "fc1_b":   uniform(ks[5], (64,), 32 * 8),
        "fc2_w":   uniform(ks[6], (1, 64), 64),
        "fc2_b":   uniform(ks[7], (1,), 64),
    }


# ----------------------------- main --------------------------------------------

if __name__ == "__main__":
    key = jax.random.PRNGKey(0)
    k_x, k_p = jax.random.split(key)

    # input: (batch=2, H=1, W=8)  ->  32*H*W = 256 = fc1 in-features
    x = jax.random.normal(k_x, (2, 1, 8), dtype=jnp.float32)
    params = init_params(k_p)

    prep = prepare_params(params, H=1, W=8)   # one-time weight preparation
    fwd = jax.jit(cnn_forward)

    out = jax.block_until_ready(fwd(x, prep))
    ref = jax.block_until_ready(cnn_reference(x, params))

    assert out.shape == (2, 1), out.shape
    assert jnp.allclose(out, ref, rtol=1e-3, atol=1e-3), (out, ref)
    print("KERNEL_OK")
</pallas_src>

<mosaic_0001>
module attributes {stable_mosaic.version = 11 : i64} {
  func.func @_fused_cnn_kernel(%arg0: i32, %arg1: memref<2x8xf32, #tpu.memory_space<vmem>>, %arg2: memref<8x128xf32, #tpu.memory_space<vmem>>, %arg3: memref<1x128xf32, #tpu.memory_space<vmem>>, %arg4: memref<128x256xf32, #tpu.memory_space<vmem>>, %arg5: memref<1x256xf32, #tpu.memory_space<vmem>>, %arg6: memref<256x64xf32, #tpu.memory_space<vmem>>, %arg7: memref<1x64xf32, #tpu.memory_space<vmem>>, %arg8: memref<1x64xf32, #tpu.memory_space<vmem>>, %arg9: memref<1x1xf32, #tpu.memory_space<vmem>>, %arg10: memref<2x1xf32, #tpu.memory_space<vmem>>) attributes {dimension_semantics = [#tpu.dimension_semantics<parallel>], iteration_bounds = array<i64: 1>, scalar_prefetch = 0 : i64, scratch_operands = 0 : i64, tpu.core_type = #tpu.core_type<tc>, window_params = [{transform_indices = @transform_0, window_bounds = array<i64: 2, 8>}, {pipeline_mode = #tpu.pipeline_mode<synchronous>, transform_indices = @transform_1, window_bounds = array<i64: 8, 128>}, {pipeline_mode = #tpu.pipeline_mode<synchronous>, transform_indices = @transform_2, window_bounds = array<i64: 1, 128>}, {pipeline_mode = #tpu.pipeline_mode<synchronous>, transform_indices = @transform_3, window_bounds = array<i64: 128, 256>}, {pipeline_mode = #tpu.pipeline_mode<synchronous>, transform_indices = @transform_4, window_bounds = array<i64: 1, 256>}, {pipeline_mode = #tpu.pipeline_mode<synchronous>, transform_indices = @transform_5, window_bounds = array<i64: 256, 64>}, {pipeline_mode = #tpu.pipeline_mode<synchronous>, transform_indices = @transform_6, window_bounds = array<i64: 1, 64>}, {pipeline_mode = #tpu.pipeline_mode<synchronous>, transform_indices = @transform_7, window_bounds = array<i64: 1, 64>}, {pipeline_mode = #tpu.pipeline_mode<synchronous>, transform_indices = @transform_8, window_bounds = array<i64: 1, 1>}, {transform_indices = @transform_9, window_bounds = array<i64: 2, 1>}]} {
    %c0 = arith.constant 0 : index
    %c0_0 = arith.constant 0 : index
    %0 = vector.load %arg1[%c0, %c0_0] : memref<2x8xf32, #tpu.memory_space<vmem>>, vector<2x8xf32>
    %c0_1 = arith.constant 0 : index
    %c0_2 = arith.constant 0 : index
    %1 = vector.load %arg2[%c0_1, %c0_2] : memref<8x128xf32, #tpu.memory_space<vmem>>, vector<8x128xf32>
    %cst = arith.constant dense<0.000000e+00> : vector<2x128xf32>
    %2 = tpu.matmul %0, %1, %cst {dimension_numbers = #tpu.dot_dimension_numbers<[1], [0], [0], [1], [0, 0, 1, 1], [], []>} : vector<2x8xf32>, vector<8x128xf32>, vector<2x128xf32> -> vector<2x128xf32>
    %c0_3 = arith.constant 0 : index
    %c0_4 = arith.constant 0 : index
    %3 = vector.load %arg3[%c0_3, %c0_4] : memref<1x128xf32, #tpu.memory_space<vmem>>, vector<1x128xf32>
    %4 = vector.broadcast %3 : vector<1x128xf32> to vector<2x128xf32>
    %5 = arith.addf %2, %4 : vector<2x128xf32>
    %cst_5 = arith.constant 0.000000e+00 : f32
    %6 = vector.broadcast %cst_5 : f32 to vector<2x128xf32>
    %7 = arith.maximumf %5, %6 : vector<2x128xf32>
    %c0_6 = arith.constant 0 : index
    %c0_7 = arith.constant 0 : index
    %8 = vector.load %arg4[%c0_6, %c0_7] : memref<128x256xf32, #tpu.memory_space<vmem>>, vector<128x256xf32>
    %cst_8 = arith.constant dense<0.000000e+00> : vector<2x256xf32>
    %9 = tpu.matmul %7, %8, %cst_8 {dimension_numbers = #tpu.dot_dimension_numbers<[1], [0], [0], [1], [0, 0, 1, 1], [], []>} : vector<2x128xf32>, vector<128x256xf32>, vector<2x256xf32> -> vector<2x256xf32>
    %c0_9 = arith.constant 0 : index
    %c0_10 = arith.constant 0 : index
    %10 = vector.load %arg5[%c0_9, %c0_10] : memref<1x256xf32, #tpu.memory_space<vmem>>, vector<1x256xf32>
    %11 = vector.broadcast %10 : vector<1x256xf32> to vector<2x256xf32>
    %12 = arith.addf %9, %11 : vector<2x256xf32>
    %cst_11 = arith.constant 0.000000e+00 : f32
    %13 = vector.broadcast %cst_11 : f32 to vector<2x256xf32>
    %14 = arith.maximumf %12, %13 : vector<2x256xf32>
    %c0_12 = arith.constant 0 : index
    %c0_13 = arith.constant 0 : index
    %15 = vector.load %arg6[%c0_12, %c0_13] : memref<256x64xf32, #tpu.memory_space<vmem>>, vector<256x64xf32>
    %cst_14 = arith.constant dense<0.000000e+00> : vector<2x64xf32>
    %16 = tpu.matmul %14, %15, %cst_14 {dimension_numbers = #tpu.dot_dimension_numbers<[1], [0], [0], [1], [0, 0, 1, 1], [], []>} : vector<2x256xf32>, vector<256x64xf32>, vector<2x64xf32> -> vector<2x64xf32>
    %c0_15 = arith.constant 0 : index
    %c0_16 = arith.constant 0 : index
    %17 = vector.load %arg7[%c0_15, %c0_16] : memref<1x64xf32, #tpu.memory_space<vmem>>, vector<1x64xf32>
    %18 = vector.broadcast %17 : vector<1x64xf32> to vector<2x64xf32>
    %19 = arith.addf %16, %18 : vector<2x64xf32>
    %cst_17 = arith.constant 0.000000e+00 : f32
    %20 = vector.broadcast %cst_17 : f32 to vector<2x64xf32>
    %21 = arith.maximumf %19, %20 : vector<2x64xf32>
    %c0_18 = arith.constant 0 : index
    %c0_19 = arith.constant 0 : index
    %22 = vector.load %arg8[%c0_18, %c0_19] : memref<1x64xf32, #tpu.memory_space<vmem>>, vector<1x64xf32>
    %23 = vector.broadcast %22 : vector<1x64xf32> to vector<2x64xf32>
    %24 = arith.mulf %21, %23 : vector<2x64xf32>
    %cst_20 = arith.constant dense<0.000000e+00> : vector<2xf32>
    %25 = vector.multi_reduction <add>, %24, %cst_20 [1] : vector<2x64xf32> to vector<2xf32>
    %26 = vector.shape_cast %25 : vector<2xf32> to vector<2x1xf32>
    %c0_21 = arith.constant 0 : index
    %c0_22 = arith.constant 0 : index
    %27 = vector.load %arg9[%c0_21, %c0_22] : memref<1x1xf32, #tpu.memory_space<vmem>>, vector<1x1xf32>
    %28 = vector.broadcast %27 : vector<1x1xf32> to vector<2x1xf32>
    %29 = arith.addf %26, %28 : vector<2x1xf32>
    %c0_23 = arith.constant 0 : index
    %c0_24 = arith.constant 0 : index
    %30 = vector.load %arg10[%c0_23, %c0_24] : memref<2x1xf32, #tpu.memory_space<vmem>>, vector<2x1xf32>
    tpu.vector_store %arg10[%c0_23, %c0_24], %29 {strides = array<i32>} : memref<2x1xf32, #tpu.memory_space<vmem>>, vector<2x1xf32>,
    return
  }
  func.func @transform_0(%arg0: i32) -> (i32, i32) {
    %c0_i32 = arith.constant 0 : i32
    %c0_i32_0 = arith.constant 0 : i32
    return %arg0, %c0_i32 : i32, i32
  }
  func.func @transform_1(%arg0: i32) -> (i32, i32) {
    %c0_i32 = arith.constant 0 : i32
    %c0_i32_0 = arith.constant 0 : i32
    %c0_i32_1 = arith.constant 0 : i32
    return %c0_i32, %c0_i32_0 : i32, i32
  }
  func.func @transform_2(%arg0: i32) -> (i32, i32) {
    %c0_i32 = arith.constant 0 : i32
    %c0_i32_0 = arith.constant 0 : i32
    %c0_i32_1 = arith.constant 0 : i32
    return %c0_i32, %c0_i32_0 : i32, i32
  }
  func.func @transform_3(%arg0: i32) -> (i32, i32) {
    %c0_i32 = arith.constant 0 : i32
    %c0_i32_0 = arith.constant 0 : i32
    %c0_i32_1 = arith.constant 0 : i32
    return %c0_i32, %c0_i32_0 : i32, i32
  }
  func.func @transform_4(%arg0: i32) -> (i32, i32) {
    %c0_i32 = arith.constant 0 : i32
    %c0_i32_0 = arith.constant 0 : i32
    %c0_i32_1 = arith.constant 0 : i32
    return %c0_i32, %c0_i32_0 : i32, i32
  }
  func.func @transform_5(%arg0: i32) -> (i32, i32) {
    %c0_i32 = arith.constant 0 : i32
    %c0_i32_0 = arith.constant 0 : i32
    %c0_i32_1 = arith.constant 0 : i32
    return %c0_i32, %c0_i32_0 : i32, i32
  }
  func.func @transform_6(%arg0: i32) -> (i32, i32) {
    %c0_i32 = arith.constant 0 : i32
    %c0_i32_0 = arith.constant 0 : i32
    %c0_i32_1 = arith.constant 0 : i32
    return %c0_i32, %c0_i32_0 : i32, i32
  }
  func.func @transform_7(%arg0: i32) -> (i32, i32) {
    %c0_i32 = arith.constant 0 : i32
    %c0_i32_0 = arith.constant 0 : i32
    %c0_i32_1 = arith.constant 0 : i32
    return %c0_i32, %c0_i32_0 : i32, i32
  }
  func.func @transform_8(%arg0: i32) -> (i32, i32) {
    %c0_i32 = arith.constant 0 : i32
    %c0_i32_0 = arith.constant 0 : i32
    %c0_i32_1 = arith.constant 0 : i32
    return %c0_i32, %c0_i32_0 : i32, i32
  }
  func.func @transform_9(%arg0: i32) -> (i32, i32) {
    %c0_i32 = arith.constant 0 : i32
    %c0_i32_0 = arith.constant 0 : i32
    return %arg0, %c0_i32 : i32, i32
  }
}

</mosaic_0001>

<bundles_post_ra>
// kernel: cnn_forward.1
= control target key start
LH: loop header
LB: loop body
LE: loop exit
PB: predicated region body
PF: predicated region fallthrough
CT: control target
= control target key end

     0   :  { %vm40_vm0 = vcmask 64512   ;;  %vm227_vm1 = vcmask 517120   ;;  %vm236_vm2 = vcmask 1024   ;;  %s513_s1 = inlined_call_operand.vmem [shape: f32[8,128], index: 1, kind: input, shape index: {}]   ;;  %s514_s0 = inlined_call_operand.vmem [shape: f32[2,8], index: 0, kind: input, shape index: {}]   ;;  %s515_s3 = inlined_call_operand.vmem [shape: f32[128,256], index: 3, kind: input, shape index: {}]   ;;  %s516_s2 = inlined_call_operand.vmem [shape: f32[1,128], index: 2, kind: input, shape index: {}]   ;;  %s517_s5 = inlined_call_operand.vmem [shape: f32[256,64], index: 5, kind: input, shape index: {}]   ;;  %s518_s6 = inlined_call_operand.vmem [shape: f32[1,64], index: 6, kind: input, shape index: {}]   ;;  %s519_s4 = inlined_call_operand.vmem [shape: f32[1,256], index: 4, kind: input, shape index: {}]   ;;  %s520_s7 = inlined_call_operand.vmem [shape: f32[1,64], index: 7, kind: input, shape index: {}]   ;;  %s521_s8 = inlined_call_operand.<no memory space> [shape: f32[1,1], index: 8, kind: input, shape index: {}]   ;;  %s522_s9 = inlined_call_operand.vmem [shape: f32[2,1], index: 9, kind: output, shape index: {}]  }
   0x1   :  { %v35_v0 = vld [vmem:[%s513_s1] sm:$0xff]  ;;  %v95_v2 = vld [vmem:[%s515_s3 + $0xf0] sm:$0xff]  ;;  %v96_v3 = vld [vmem:[%s515_s3 + $0xf8] sm:$0xff] }
   0x2   :  { %v34_v1 = vld [vmem:[%s514_s0] sm:$0x3]  ;;  %59 = vmatpush.msra.mxu0 %v35_v0  ;;  %103 = vmatpush.msra.mxu1 %v95_v2  ;;  %v94_v5 = vld [vmem:[%s515_s3 + $0xe8] sm:$0xff]  ;;  %v91_v6 = vld [vmem:[%s515_s3 + $0xd0] sm:$0xff] }
   0x3   :  { %v93_v4 = vld [vmem:[%s515_s3 + $0xe0] sm:$0xff]  ;;  %242 = vmatmul.msk.f32.vlgmr.msra.gmra.mxu0 %vm40_vm0, %v34_v1  ;;  %123 = vmatpush.msra.mxu2 %v96_v3  ;;  %v92_v7 = vld [vmem:[%s515_s3 + $0xd8] sm:$0xff]  ;;  %v90_v9 = vld [vmem:[%s515_s3 + $0xc8] sm:$0xff] }
   0x4   :  { %104 = vmatpush.msra.mxu1 %v93_v4  ;;  %v89_v8 = vld [vmem:[%s515_s3 + $0xc0] sm:$0xff]  ;;  %v87_v10 = vld [vmem:[%s515_s3 + $0xb0] sm:$0xff]  ;;  %v88_v11 = vld [vmem:[%s515_s3 + $0xb8] sm:$0xff] }
   0x5   :  { %124 = vmatpush.msra.mxu2 %v94_v5  ;;  %v85_v12 = vld [vmem:[%s515_s3 + $0xa0] sm:$0xff]  ;;  %v86_v13 = vld [vmem:[%s515_s3 + $0xa8] sm:$0xff]  ;;  %v83_v14 = vld [vmem:[%s515_s3 + $0x90] sm:$0xff] }
   0x6   :  { %105 = vmatpush.msra.mxu1 %v91_v6  ;;  %v84_v15 = vld [vmem:[%s515_s3 + $0x98] sm:$0xff]  ;;  %v81_v16 = vld [vmem:[%s515_s3 + $0x80] sm:$0xff]  ;;  %v82_v17 = vld [vmem:[%s515_s3 + $0x88] sm:$0xff] }
   0x7   :  { %125 = vmatpush.msra.mxu2 %v92_v7  ;;  %v79_v18 = vld [vmem:[%s515_s3 + $0x70] sm:$0xff]  ;;  %v80_v19 = vld [vmem:[%s515_s3 + $0x78] sm:$0xff]  ;;  %v77_v20 = vld [vmem:[%s515_s3 + $0x60] sm:$0xff] }
   0x8   :  { %106 = vmatpush.msra.mxu1 %v89_v8  ;;  %v78_v21 = vld [vmem:[%s515_s3 + $0x68] sm:$0xff]  ;;  %v75_v22 = vld [vmem:[%s515_s3 + $0x50] sm:$0xff]  ;;  %v76_v23 = vld [vmem:[%s515_s3 + $0x58] sm:$0xff] }
   0x9   :  { %126 = vmatpush.msra.mxu2 %v90_v9  ;;  %v73_v24 = vld [vmem:[%s515_s3 + $0x40] sm:$0xff]  ;;  %v74_v25 = vld [vmem:[%s515_s3 + $0x48] sm:$0xff]  ;;  %v71_v26 = vld [vmem:[%s515_s3 + $0x30] sm:$0xff] }
   0xa   :  { %107 = vmatpush.msra.mxu1 %v87_v10  ;;  %v72_v27 = vld [vmem:[%s515_s3 + $0x38] sm:$0xff]  ;;  %v69_v28 = vld [vmem:[%s515_s3 + $0x20] sm:$0xff]  ;;  %v70_v29 = vld [vmem:[%s515_s3 + $0x28] sm:$0xff] }
   0xb   :  { %127 = vmatpush.msra.mxu2 %v88_v11  ;;  %v67_v30 = vld [vmem:[%s515_s3 + $0x10] sm:$0xff]  ;;  %v68_v31 = vld [vmem:[%s515_s3 + $0x18] sm:$0xff]  ;;  %v65_v32 = vld [vmem:[%s515_s3] sm:$0xff] }
   0xc   :  { %108 = vmatpush.msra.mxu1 %v85_v12  ;;  %v66_v33 = vld [vmem:[%s515_s3 + $0x8] sm:$0xff]  ;;  %v160_v34 = vld [vmem:[%s517_s5 + $0x78] sm:$0xff]  ;;  %v159_v35 = vld [vmem:[%s517_s5 + $0x70] sm:$0xff] }
   0xd   :  { %128 = vmatpush.msra.mxu2 %v86_v13  ;;  %181 = vmatpush.msra.mxu3 %v160_v34  ;;  %v176_v36 = vld [vmem:[%s517_s5 + $0xf8] sm:$0xff]  ;;  %v158_v37 = vld [vmem:[%s517_s5 + $0x68] sm:$0xff]  ;;  %v175_v38 = vld [vmem:[%s517_s5 + $0xf0] sm:$0xff] }
   0xe   :  { %109 = vmatpush.msra.mxu1 %v83_v14  ;;  %201 = vmatpush.msrb.mxu0 %v176_v36  ;;  %v174_v39 = vld [vmem:[%s517_s5 + $0xe8] sm:$0xff]  ;;  %v157_v40 = vld [vmem:[%s517_s5 + $0x60] sm:$0xff]  ;;  %v156_v42 = vld [vmem:[%s517_s5 + $0x58] sm:$0xff] }
   0xf   :  { %129 = vmatpush.msra.mxu2 %v84_v15  ;;  %182 = vmatpush.msra.mxu3 %v159_v35  ;;  %v173_v41 = vld [vmem:[%s517_s5 + $0xe0] sm:$0xff]  ;;  %v172_v43 = vld [vmem:[%s517_s5 + $0xd8] sm:$0xff]  ;;  %v155_v44 = vld [vmem:[%s517_s5 + $0x50] sm:$0xff]  ;;  %v14_v15 = vstv %s521_s8 }
  0x10   :  { %110 = vmatpush.msra.mxu1 %v81_v16  ;;  %202 = vmatpush.msrb.mxu0 %v175_v38  ;;  %v171_v45 = vld [vmem:[%s517_s5 + $0xd0] sm:$0xff]  ;;  %v154_v46 = vld [vmem:[%s517_s5 + $0x48] sm:$0xff]  ;;  %v153_v48 = vld [vmem:[%s517_s5 + $0x40] sm:$0xff]  ;;  %15 = vst [vmem:[#allocation2] sm:$0x1] %v14_v15 }
  0x11   :  { %130 = vmatpush.msra.mxu2 %v82_v17  ;;  %183 = vmatpush.msra.mxu3 %v158_v37  ;;  %v170_v47 = vld [vmem:[%s517_s5 + $0xc8] sm:$0xff]  ;;  %v169_v49 = vld [vmem:[%s517_s5 + $0xc0] sm:$0xff]  ;;  %v152_v50 = vld [vmem:[%s517_s5 + $0x38] sm:$0xff] }
  0x12   :  { %111 = vmatpush.msra.mxu1 %v79_v18  ;;  %203 = vmatpush.msrb.mxu0 %v174_v39  ;;  %v168_v51 = vld [vmem:[%s517_s5 + $0xb8] sm:$0xff]  ;;  %v151_v52 = vld [vmem:[%s517_s5 + $0x30] sm:$0xff]  ;;  %v150_v54 = vld [vmem:[%s517_s5 + $0x28] sm:$0xff] }
  0x13   :  { %131 = vmatpush.msra.mxu2 %v80_v19  ;;  %184 = vmatpush.msra.mxu3 %v157_v40  ;;  %v167_v53 = vld [vmem:[%s517_s5 + $0xb0] sm:$0xff]  ;;  %v149_v55 = vld [vmem:[%s517_s5 + $0x20] sm:$0xff]  ;;  %v148_v56 = vld [vmem:[%s517_s5 + $0x18] sm:$0xff] }
  0x14   :  { %112 = vmatpush.msra.mxu1 %v77_v20  ;;  %204 = vmatpush.msrb.mxu0 %v173_v41  ;;  %v243_v57 = vld [vmem:[%s516_s2] ss:$0 sm:$0xff]  ;;  %v147_v61 = vld [vmem:[%s517_s5 + $0x10] sm:$0xff]  ;;  %v166_v62 = vld [vmem:[%s517_s5 + $0xa8] sm:$0xff] }
  0x15   :  { %132 = vmatpush.msra.mxu2 %v78_v21  ;;  %185 = vmatpush.msra.mxu3 %v156_v42  ;;  %v146_v63 = vld [vmem:[%s517_s5 + $0x8] sm:$0xff]  ;;  %v165_v0 = vld [vmem:[%s517_s5 + $0xa0] sm:$0xff]  ;;  %v164_v2 = vld [vmem:[%s517_s5 + $0x98] sm:$0xff] }
  0x16   :  { %113 = vmatpush.msra.mxu1 %v75_v22  ;;  %205 = vmatpush.msrb.mxu0 %v172_v43  ;;  %v145_v1 = vld [vmem:[%s517_s5] sm:$0xff]  ;;  %v163_v3 = vld [vmem:[%s517_s5 + $0x90] sm:$0xff]  ;;  %v162_v4 = vld [vmem:[%s517_s5 + $0x88] sm:$0xff] }
  0x17   :  { %133 = vmatpush.msra.mxu2 %v76_v23  ;;  %186 = vmatpush.msra.mxu3 %v155_v44  ;;  %v161_v5 = vld [vmem:[%s517_s5 + $0x80] sm:$0xff] }
  0x18   :  { %114 = vmatpush.msra.mxu1 %v73_v24  ;;  %206 = vmatpush.msrb.mxu0 %v171_v45  ;;  %v97_v6 = vld [vmem:[%s519_s4] sm:$0x3] }
  0x19   :  { %134 = vmatpush.msra.mxu2 %v74_v25  ;;  %187 = vmatpush.msra.mxu3 %v154_v46  ;;  %v99_v7 = vperm.slane %v97_v6, 0  ;;  %v100_v11 = vperm.slane %v97_v6, 1  ;;  %v244_v16 = vld [vmem:[%s518_s6] ss:$0 sm:$0xff] }
  0x1a   :  { %115 = vmatpush.msra.mxu1 %v71_v26  ;;  %207 = vmatpush.msrb.mxu0 %v170_v47  ;;  %v245_v21 = vld [vmem:[%s520_s7] ss:$0 sm:$0xff] }
  0x1b   :  { %135 = vmatpush.msra.mxu2 %v72_v27  ;;  %188 = vmatpush.msra.mxu3 %v153_v48  ;;  %v246_v25 = vld [vmem:[#allocation2] ss:$0 sm:$0xff] }
  0x1c   :  { %116 = vmatpush.msra.mxu1 %v69_v28  ;;  %208 = vmatpush.msrb.mxu0 %v169_v49 }
  0x1d   :  { %136 = vmatpush.msra.mxu2 %v70_v29  ;;  %189 = vmatpush.msra.mxu3 %v152_v50 }
  0x1e   :  { %117 = vmatpush.msra.mxu1 %v67_v30  ;;  %209 = vmatpush.msrb.mxu0 %v168_v51 }
  0x1f   :  { %137 = vmatpush.msra.mxu2 %v68_v31  ;;  %190 = vmatpush.msra.mxu3 %v151_v52 }
  0x20   :  { %118 = vmatpush.msra.mxu1 %v65_v32  ;;  %210 = vmatpush.msrb.mxu0 %v167_v53 }
  0x21   :  { %138 = vmatpush.msra.mxu2 %v66_v33  ;;  %191 = vmatpush.msra.mxu3 %v150_v54 }
  0x22   :  { %211 = vmatpush.msrb.mxu0 %v166_v62 }
  0x23   :  { %192 = vmatpush.msra.mxu3 %v149_v55 }
  0x24   :  { %212 = vmatpush.msrb.mxu0 %v165_v0 }
  0x25   :  { %193 = vmatpush.msra.mxu3 %v148_v56 }
  0x26   :  { %213 = vmatpush.msrb.mxu0 %v164_v2 }
  0x27   :  { %194 = vmatpush.msra.mxu3 %v147_v61 }
  0x28   :  { %214 = vmatpush.msrb.mxu0 %v163_v3 }
  0x29   :  { %195 = vmatpush.msra.mxu3 %v146_v63 }
  0x2a   :  { %215 = vmatpush.msrb.mxu0 %v162_v4 }
  0x2b   :  { %196 = vmatpush.msra.mxu3 %v145_v1 }
  0x2c   :  { %216 = vmatpush.msrb.mxu0 %v161_v5 }
  0x80   :  { %v61_v58 = vpop.f32.mrf.mxu0 }
  0x81   :  { %v62_v59 = vadd.f32 %v243_v57, %v61_v58 }
  0x83   :  { %v64_v60 = vmax.f32 %v62_v59, 0.0 }
  0x85   :  { %119 = vmatmul.f32.vlgmr.msra.gmra.mxu1 %v64_v60  ;;  %139 = vmatmul.f32.vlgmr.msra.gmra.mxu2 %v64_v60 }
 0x102   :  { %v120_v8 = vpop.f32.mrf.mxu1 }
 0x103   :  { %v121_v9 = vadd.f32 %v120_v8, %v99_v7 }
 0x105   :  { %v143_v10 = vmax.f32 %v121_v9, 0.0 }
 0x107   :  { %197 = vmatmul.f32.vlgmr.msra.gmra.mxu3 %v143_v10 }
 0x108   :  { %v140_v12 = vpop.f32.mrf.mxu2 }
 0x109   :  { %v141_v13 = vadd.f32 %v140_v12, %v100_v11 }
 0x10b   :  { %v144_v14 = vmax.f32 %v141_v13, 0.0 }
 0x10d   :  { %217 = vmatmul.f32.vlgmr.msrb.gmra.mxu0 %v144_v14 }
 0x18a   :  { %v198_v17 = vpop.f32.mrf.mxu3  ;;  %v218_v19 = vpop.f32.mrf.mxu0 }
 0x18b   :  { %v199_v18 = vadd.f32 %v244_v16, %v198_v17 }
 0x18d   :  { %v219_v20 = vadd.f32 %v218_v19, %v199_v18 }
 0x18f   :  { %v221_v22 = vmax.f32 %v219_v20, 0.0 }
 0x191   :  { %v226_v23 = vmul.f32 %v245_v21, %v221_v22 }
 0x193   :  { %v228_v24 = vsel %vm227_vm1, %v226_v23, 0.0 }
 0x194   :  { %229 = vadd.xlane.f32.xlu0 %v228_v24 }
 0x207   :  { %v230_v26 = vpop.xlane.xlu0 %229 }
 0x208   :  { %v235_v27 = vadd.f32 %v246_v25, %v230_v26 }
 0x20a   :  { %237 = vst.msk [vmem:[%s522_s9] sm:$0x3] %vm236_vm2, %v235_v27 }

</bundles_post_ra>
